<compile_context>
chip_gen: v6e
topology: v6e:2x2x1
jax: 0.10.0
libtpu: 0.0.40
codegen_flags: <defaults>
</compile_context>

<pallas_src>
import jax
import jax.numpy as jnp
from jax import lax
from jax.experimental import pallas as pl
from jax.experimental.pallas import tpu as pltpu


def _router_kernel(x_ref, w1_ref, w2_ref, o_ref, acc_ref):
    # x_ref:  (tm, H)           token tile, native dtype
    # w1_ref: (tk, H)           chunk of layer-1 weight, PyTorch (out, in) layout
    # w2_ref: (out_pad, tk)     chunk of layer-2 weight, out_dim padded to sublane mult
    # o_ref:  (out_pad, tm)     transposed output tile (tokens on the lane axis)
    # acc_ref:(out_pad, tm) f32 accumulator across 2H chunks
    k = pl.program_id(1)

    @pl.when(k == 0)
    def _():
        acc_ref[...] = jnp.zeros_like(acc_ref)

    # h = x @ w1_chunk.T  ("NT" contraction -> fed to the MXU directly).
    h = lax.dot_general(
        x_ref[...], w1_ref[...],
        dimension_numbers=(((1,), (1,)), ((), ())),
        preferred_element_type=jnp.float32,
    )

    # Exact GELU (PyTorch default): 0.5*h*(1+erf(h/sqrt(2))), in f32.
    g = 0.5 * h * (1.0 + lax.erf(h * jnp.float32(0.7071067811865476)))

    # acc += w2_chunk @ g.T  -> (out_pad, tm): token axis stays lane-dense.
    acc_ref[...] += lax.dot_general(
        w2_ref[...], g.astype(w2_ref.dtype),
        dimension_numbers=(((1,), (1,)), ((), ())),
        preferred_element_type=jnp.float32,
    )

    @pl.when(k == pl.num_programs(1) - 1)
    def _():
        o_ref[...] = acc_ref[...].astype(o_ref.dtype)


def _round_up(a, b):
    return ((a + b - 1) // b) * b


def _spec(shape, index_map, mode):
    # Only pass pipeline_mode when explicitly requested (keeps the default path minimal).
    if mode is None:
        return pl.BlockSpec(shape, index_map)
    return pl.BlockSpec(shape, index_map, pipeline_mode=mode)


def wide_mlp_router(x, w1, w2):
    """y = GELU(x @ w1.T) @ w2.T with PyTorch (out_features, in_features) weights."""
    orig_shape = x.shape
    H = int(orig_shape[-1])
    x2d = x.reshape(-1, H)
    M = int(x2d.shape[0])

    two_h = int(w1.shape[0])
    out_dim = int(w2.shape[0])
    assert w1.shape == (two_h, H) and w2.shape == (out_dim, two_h)

    isz = jnp.dtype(x.dtype).itemsize
    w_isz = jnp.dtype(w1.dtype).itemsize

    # ---- per-generation VMEM budget ----------------------------------------
    try:
        vmem_cap = int(pltpu.get_tpu_info().vmem_capacity_bytes)
    except Exception:
        vmem_cap = 64 << 20                      # conservative (v7x per-TC) fallback
    vmem_cap = max(vmem_cap, 32 << 20)
    design_budget = (vmem_cap * 5) // 8          # headroom for Mosaic internals

    # ---- token tile ----------------------------------------------------------
    LANE = 128
    if M >= LANE:
        tm_target = max(LANE, min((((1 << 20) // (H * isz)) // LANE) * LANE, 2048))
        tm = min(tm_target, (M // LANE) * LANE)  # tm <= M; last block may be partial
    else:
        tm = M                                   # single tile; block == full array dims
    num_m = int(pl.cdiv(M, tm))

    # out_dim padded only to the output dtype's sublane packing (8 f32 / 16 bf16).
    sub = 8 * max(1, 4 // isz)
    out_pad = _round_up(out_dim, sub)

    # Extra x buffer hides DMA issue latency in the tiny-tile / many-step regime.
    x_bufs = 3 if (num_m >= 3 and tm * H * isz <= (2 << 20)) else 2

    def footprint(tk, w_bufs):
        return (x_bufs * tm * H * isz            # x tiles
                + w_bufs * tk * H * w_isz        # w1 chunk(s)
                + w_bufs * out_pad * tk * w_isz  # w2 chunk(s)
                + 2 * out_pad * tm * isz         # output tiles
                + out_pad * tm * 4               # f32 accumulator scratch
                + 2 * tm * tk * 4)               # f32 h / gelu intermediates

    # ---- 2H chunking: resident weights vs streamed ---------------------------
    w_bytes = (two_h * H + out_pad * two_h) * w_isz
    single_buffer_w = w_bytes > (1 << 20)        # only bother when weights are big
    res_w_bufs = 1 if single_buffer_w else 2
    if footprint(two_h, res_w_bufs) <= design_budget:
        tk, num_k, w_bufs = two_h, 1, res_w_bufs
    else:
        tk = 2048
        while tk > 256 and footprint(tk, 2) > design_budget:
            tk //= 2
        num_k = int(pl.cdiv(two_h, tk))
        w_bufs = 2
        single_buffer_w = False
        # TODO(synk): if even tk=256 overflows the budget (huge H at max tm), also
        # shrink tm; unreachable for router-sized problems.

    # Zero-pad the 2H axis to a multiple of tk (zeros -> GELU(0)=0 -> contributes +0).
    two_h_p = num_k * tk
    w1p = w1 if two_h_p == two_h else jnp.pad(w1, ((0, two_h_p - two_h), (0, 0)))
    w2p = jnp.pad(w2, ((0, out_pad - out_dim), (0, two_h_p - two_h)))

    vmem_needed = footprint(tk, w_bufs)
    vmem_limit = int(min(max(vmem_needed * 5 // 4, 16 << 20), (vmem_cap * 7) // 8))

    cost = pl.CostEstimate(
        flops=2 * M * H * two_h + 2 * M * two_h * out_dim,
        transcendentals=M * two_h,
        bytes_accessed=(M * H * isz + two_h_p * H * w_isz
                        + out_pad * two_h_p * w_isz + M * out_pad * isz),
    )

    w_mode = pl.Buffered(1) if (num_k == 1 and single_buffer_w) else None
    x_mode = pl.Buffered(3) if x_bufs == 3 else None

    out_t = pl.pallas_call(
        _router_kernel,
        out_shape=jax.ShapeDtypeStruct((out_pad, M), x.dtype),
        grid_spec=pltpu.PrefetchScalarGridSpec(
            num_scalar_prefetch=0,
            grid=(num_m, num_k),
            in_specs=[
                _spec((tm, H), lambda i, k: (i, 0), x_mode),
                _spec((tk, H), lambda i, k: (k, 0), w_mode),
                _spec((out_pad, tk), lambda i, k: (0, k), w_mode),
            ],
            out_specs=pl.BlockSpec((out_pad, tm), lambda i, k: (0, i)),
            scratch_shapes=[pltpu.VMEM((out_pad, tm), jnp.float32)],
        ),
        compiler_params=pltpu.CompilerParams(
            dimension_semantics=("parallel", "arbitrary"),
            vmem_limit_bytes=vmem_limit,
        ),
        cost_estimate=cost,
    )(x2d, w1p, w2p)

    # (out_pad, M) -> (..., out_dim)
    out = out_t[:out_dim, :].T
    return out.reshape(*orig_shape[:-1], out_dim)


def _reference(x, w1, w2):
    h = jnp.einsum("...h,oh->...o", x, w1)
    g = 0.5 * h * (1.0 + lax.erf(h * jnp.float32(0.7071067811865476)))
    return jnp.einsum("...c,oc->...o", g, w2)


if __name__ == "__main__":
    # Config analogue: hidden_size=32, initializer_range=0.02, out_dim=1.
    batch, seq, hidden, out_dim = 2, 8, 32, 1
    initializer_range = 0.02

    key = jax.random.PRNGKey(0)
    kx, k1, k2 = jax.random.split(key, 3)

    x = jax.random.normal(kx, (batch, seq, hidden), dtype=jnp.float32)
    # PyTorch nn.Linear weight layouts: (out_features, in_features), init N(0, std).
    w1 = initializer_range * jax.random.normal(k1, (2 * hidden, hidden), dtype=jnp.float32)
    w2 = initializer_range * jax.random.normal(k2, (out_dim, 2 * hidden), dtype=jnp.float32)

    y = jax.block_until_ready(wide_mlp_router(x, w1, w2))
    y_ref = _reference(x, w1, w2)

    assert y.shape == (batch, seq, out_dim), y.shape
    assert jnp.allclose(y, y_ref, atol=1e-5, rtol=1e-4), float(jnp.max(jnp.abs(y - y_ref)))
    print("KERNEL_OK")
</pallas_src>

<mosaic_0001>
module attributes {stable_mosaic.version = 11 : i64} {
  func.func @_router_kernel(%arg0: i32, %arg1: i32, %arg2: memref<16x32xf32, #tpu.memory_space<vmem>>, %arg3: memref<64x32xf32, #tpu.memory_space<vmem>>, %arg4: memref<8x64xf32, #tpu.memory_space<vmem>>, %arg5: memref<8x16xf32, #tpu.memory_space<vmem>>, %arg6: memref<8x16xf32, #tpu.memory_space<vmem>>) attributes {dimension_semantics = [#tpu.dimension_semantics<parallel>, #tpu.dimension_semantics<arbitrary>], iteration_bounds = array<i64: 1, 1>, scalar_prefetch = 0 : i64, scratch_operands = 1 : i64, tpu.core_type = #tpu.core_type<tc>, window_params = [{transform_indices = @transform_0, window_bounds = array<i64: 16, 32>}, {transform_indices = @transform_1, window_bounds = array<i64: 64, 32>}, {transform_indices = @transform_2, window_bounds = array<i64: 8, 64>}, {transform_indices = @transform_3, window_bounds = array<i64: 8, 16>}]} {
    %c0_i32 = arith.constant 0 : i32
    %0 = arith.cmpi eq, %arg1, %c0_i32 : i32
    %1 = arith.extui %0 : i1 to i32
    %c0_i32_0 = arith.constant 0 : i32
    %2 = arith.cmpi ne, %1, %c0_i32_0 : i32
    scf.if %2 {
      %cst_16 = arith.constant 0.000000e+00 : f32
      %22 = vector.broadcast %cst_16 : f32 to vector<8x16xf32>
      %c0_17 = arith.constant 0 : index
      %c0_18 = arith.constant 0 : index
      %23 = vector.load %arg6[%c0_17, %c0_18] : memref<8x16xf32, #tpu.memory_space<vmem>>, vector<8x16xf32>
      tpu.vector_store %arg6[%c0_17, %c0_18], %22 {strides = array<i32>} : memref<8x16xf32, #tpu.memory_space<vmem>>, vector<8x16xf32>,
    } else {
    }
    %c0 = arith.constant 0 : index
    %c0_1 = arith.constant 0 : index
    %3 = vector.load %arg2[%c0, %c0_1] : memref<16x32xf32, #tpu.memory_space<vmem>>, vector<16x32xf32>
    %c0_2 = arith.constant 0 : index
    %c0_3 = arith.constant 0 : index
    %4 = vector.load %arg3[%c0_2, %c0_3] : memref<64x32xf32, #tpu.memory_space<vmem>>, vector<64x32xf32>
    %cst = arith.constant dense<0.000000e+00> : vector<16x64xf32>
    %5 = tpu.matmul %3, %4, %cst {dimension_numbers = #tpu.dot_dimension_numbers<[1], [1], [0], [0], [0, 0, 1, 0], [], []>} : vector<16x32xf32>, vector<64x32xf32>, vector<16x64xf32> -> vector<16x64xf32>
    %cst_4 = arith.constant 5.000000e-01 : f32
    %6 = vector.broadcast %cst_4 : f32 to vector<16x64xf32>
    %7 = arith.mulf %6, %5 : vector<16x64xf32>
    %cst_5 = arith.constant 0.707106769 : f32
    %8 = vector.broadcast %cst_5 : f32 to vector<16x64xf32>
    %9 = arith.mulf %5, %8 : vector<16x64xf32>
    %10 = math.erf %9 : vector<16x64xf32>
    %cst_6 = arith.constant 1.000000e+00 : f32
    %11 = vector.broadcast %cst_6 : f32 to vector<16x64xf32>
    %12 = arith.addf %11, %10 : vector<16x64xf32>
    %13 = arith.mulf %7, %12 : vector<16x64xf32>
    %c0_7 = arith.constant 0 : index
    %c0_8 = arith.constant 0 : index
    %14 = vector.load %arg6[%c0_7, %c0_8] : memref<8x16xf32, #tpu.memory_space<vmem>>, vector<8x16xf32>
    %c0_9 = arith.constant 0 : index
    %c0_10 = arith.constant 0 : index
    %15 = vector.load %arg4[%c0_9, %c0_10] : memref<8x64xf32, #tpu.memory_space<vmem>>, vector<8x64xf32>
    %cst_11 = arith.constant dense<0.000000e+00> : vector<8x16xf32>
    %16 = tpu.matmul %15, %13, %cst_11 {dimension_numbers = #tpu.dot_dimension_numbers<[1], [1], [0], [0], [0, 0, 1, 0], [], []>} : vector<8x64xf32>, vector<16x64xf32>, vector<8x16xf32> -> vector<8x16xf32>
    %17 = arith.addf %14, %16 : vector<8x16xf32>
    %c0_12 = arith.constant 0 : index
    %c0_13 = arith.constant 0 : index
    %18 = vector.load %arg6[%c0_12, %c0_13] : memref<8x16xf32, #tpu.memory_space<vmem>>, vector<8x16xf32>
    tpu.vector_store %arg6[%c0_12, %c0_13], %17 {strides = array<i32>} : memref<8x16xf32, #tpu.memory_space<vmem>>, vector<8x16xf32>,
    %c0_i32_14 = arith.constant 0 : i32
    %19 = arith.cmpi eq, %arg1, %c0_i32_14 : i32
    %20 = arith.extui %19 : i1 to i32
    %c0_i32_15 = arith.constant 0 : i32
    %21 = arith.cmpi ne, %20, %c0_i32_15 : i32
    scf.if %21 {
      %c0_16 = arith.constant 0 : index
      %c0_17 = arith.constant 0 : index
      %22 = vector.load %arg6[%c0_16, %c0_17] : memref<8x16xf32, #tpu.memory_space<vmem>>, vector<8x16xf32>
      %c0_18 = arith.constant 0 : index
      %c0_19 = arith.constant 0 : index
      %23 = vector.load %arg5[%c0_18, %c0_19] : memref<8x16xf32, #tpu.memory_space<vmem>>, vector<8x16xf32>
      tpu.vector_store %arg5[%c0_18, %c0_19], %22 {strides = array<i32>} : memref<8x16xf32, #tpu.memory_space<vmem>>, vector<8x16xf32>,
    } else {
    }
    return
  }
  func.func @transform_0(%arg0: i32, %arg1: i32) -> (i32, i32) {
    %c0_i32 = arith.constant 0 : i32
    %c0_i32_0 = arith.constant 0 : i32
    return %arg0, %c0_i32 : i32, i32
  }
  func.func @transform_1(%arg0: i32, %arg1: i32) -> (i32, i32) {
    %c0_i32 = arith.constant 0 : i32
    %c0_i32_0 = arith.constant 0 : i32
    return %arg1, %c0_i32 : i32, i32
  }
  func.func @transform_2(%arg0: i32, %arg1: i32) -> (i32, i32) {
    %c0_i32 = arith.constant 0 : i32
    %c0_i32_0 = arith.constant 0 : i32
    return %c0_i32, %arg1 : i32, i32
  }
  func.func @transform_3(%arg0: i32, %arg1: i32) -> (i32, i32) {
    %c0_i32 = arith.constant 0 : i32
    %c0_i32_0 = arith.constant 0 : i32
    return %c0_i32, %arg0 : i32, i32
  }
}

</mosaic_0001>

<bundles_post_ra>
// kernel: tpu_custom_call.1
= control target key start
LH: loop header
LB: loop body
LE: loop exit
PB: predicated region body
PF: predicated region fallthrough
CT: control target
= control target key end

     0   :  { %vm31_vm0 = vcmask 261120   ;;  %s412_s0 = inlined_call_operand.vmem [shape: f32[16,32], index: 0, kind: input, shape index: {}]   ;;  %s413_s1 = inlined_call_operand.vmem [shape: f32[64,32], index: 1, kind: input, shape index: {}]   ;;  %s414_s2 = inlined_call_operand.vmem [shape: f32[8,64], index: 2, kind: input, shape index: {}]   ;;  %s415_s3 = inlined_call_operand.hbm [shape: f32[8,16], index: 3, kind: output, shape index: {}]  }
   0x1   :  { %v30_v0 = vld [vmem:[%s413_s1 + $0x38] sm:$0xff]  ;;  %v29_v1 = vld [vmem:[%s413_s1 + $0x30] sm:$0xff]  ;;  %v21_v2 = vld [vmem:[%s412_s0] sm:$0xff] }
   0x2   :  { %277 = vmatprep.subr.msk.mxu0 %vm31_vm0, %v30_v0  ;;  %293 = vmatprep.mubr.msk.f32.mxu0 %vm31_vm0, %v21_v2 }
   0x3   :  { %278 = vmatpush3.xpose.msk.msra.mxu0 %vm31_vm0, %v30_v0 }
   0x4   :  { %279 = vmatprep.subr.msk.mxu0 %vm31_vm0, %v29_v1 }
   0x5   :  { %8 = vsyncpa [#allocation4], 0  ;;  %v28_v3 = vld [vmem:[%s413_s1 + $0x28] sm:$0xff]  ;;  %v27_v4 = vld [vmem:[%s413_s1 + $0x20] sm:$0xff]  ;;  %v332_v10 = vmov 0.0   ;;  %vm333_vm1 = vmmov 0  }
   0x6   :  { %v26_v5 = vld [vmem:[%s413_s1 + $0x18] sm:$0xff]  ;;  %v25_v6 = vld [vmem:[%s413_s1 + $0x10] sm:$0xff]  ;;  %v24_v7 = vld [vmem:[%s413_s1 + $0x8] sm:$0xff]  ;;  %296 = vmatprep.subr.mxu1 %v332_v10  ;;  %300 = vmatprep.mubr.msk.f32.mxu1 %vm333_vm1, %v332_v10  ;;  %vm19_vm2 = vcmask 130048   ;;  %vm149_vm3 = vcmask 523264   ;;  %s334_s5 = smov [#allocation3]  }
   0x7   :  { %280 = vmatpush3.xpose.msk.msra.mxu0 %vm31_vm0, %v29_v1  ;;  %v23_v8 = vld [vmem:[%s413_s1] sm:$0xff]  ;;  %v22_v9 = vld [vmem:[%s412_s0 + $0x8] sm:$0xff]  ;;  %20 = vst.msk [vmem:[#allocation2] sm:$0xff] %vm19_vm2, %v332_v10  ;;  %s243_s6 = sshll.u32 %s334_s5, 4  ;;  %s244_s6 = int_to_ptr.vmem [resolvable:$true] %s243_s6 }
   0x8   :  { %281 = vmatprep.subr.msk.mxu0 %vm31_vm0, %v28_v3  ;;  %v148_v23 = vld [vmem:[%s414_s2] sm:$0xff]  ;;  %s310_s7 = scalar_lea.vmem %s244_s6, 128  ;;  %p315_p1 = scmp.lt.s32.totalorder %s244_s6, %s244_s6 }
   0x9   :  { %p311_p0 = scmp.ne.s32.totalorder %s244_s6, %s310_s7  ;;  %p316_p2 = scmp.lt.s32.totalorder %s310_s7, %s310_s7 }
   0xb   :  { %282 = vmatpush3.xpose.msk.msra.mxu0 %vm31_vm0, %v28_v3  ;;  %p317_p3 = por %p316_p2, %p315_p1 }
   0xc   :  { %283 = vmatprep.subr.msk.mxu0 %vm31_vm0, %v27_v4 }
   0xd   :  { %p318_p4 = pnand %p317_p3, %p311_p0 }
   0xe   :  { %v147_v24 = vld [vmem:[#allocation2] sm:$0xff] }
   0xf   :  { %284 = vmatpush3.xpose.msk.msra.mxu0 %vm31_vm0, %v27_v4 }
  0x10   :  { %285 = vmatprep.subr.msk.mxu0 %vm31_vm0, %v26_v5 }
  0x13   :  { %286 = vmatpush3.xpose.msk.msra.mxu0 %vm31_vm0, %v26_v5 }
  0x14   :  { %287 = vmatprep.subr.msk.mxu0 %vm31_vm0, %v25_v6 }
  0x17   :  { %288 = vmatpush3.xpose.msk.msra.mxu0 %vm31_vm0, %v25_v6 }
  0x18   :  { %289 = vmatprep.subr.msk.mxu0 %vm31_vm0, %v24_v7 }
  0x1b   :  { %290 = vmatpush3.xpose.msk.msra.mxu0 %vm31_vm0, %v24_v7 }
  0x1c   :  { %291 = vmatprep.subr.msk.mxu0 %vm31_vm0, %v23_v8 }
  0x1f   :  { %292 = vmatpush3.xpose.msk.msra.mxu0 %vm31_vm0, %v23_v8 }
  0x22   :  { %294 = vmatmul.mubr.msk.f32.vlgmr.msra.gmra.mxu0 %vm31_vm0, %v22_v9 }
  0xe2   :  { %v295_v11 = vpop.f32.mrf.mxu0 }
  0xe3   :  { %v140_v12 = vmul.f32 0.70710677, %v295_v11  ;;  %v138_v16 = vmul.f32 0.5, %v295_v11 }
  0xe4   :  { %v128_v13 = vpop.f32.mrf.mxu0 }
  0xe5   :  { %306 = verf.f32 %v140_v12  ;;  %v139_v14 = vmul.f32 0.70710677, %v128_v13  ;;  %v137_v21 = vmul.f32 0.5, %v128_v13 }
  0xe7   :  { %308 = verf.f32 %v139_v14 }
  0xf2   :  { %v307_v15 = vpop.eup %306 }
  0xf3   :  { %v144_v17 = vadd.f32 1.0, %v307_v15 }
  0xf4   :  { %v309_v18 = vpop.eup %308 }
  0xf5   :  { %v146_v19 = vmul.f32 %v144_v17, %v138_v16  ;;  %v143_v20 = vadd.f32 1.0, %v309_v18 }
  0xf7   :  { %297 = vmatpush3.xpose.msk.msra.mxu1 %vm149_vm3, %v146_v19  ;;  %v145_v22 = vmul.f32 %v143_v20, %v137_v21 }
  0xf8   :  { %298 = vmatprep.subr.mxu1 %v332_v10 }
  0xfb   :  { %299 = vmatpush3.xpose.msk.msra.mxu1 %vm149_vm3, %v145_v22 }
  0xfe   :  { %301 = vmatmul.mubr.msk.f32.vlgmr.msra.gmra.mxu1 %vm149_vm3, %v148_v23 }
 0x1be   :  { %v225_v25 = vpop.f32.mrf.mxu1 }
 0x1bf   :  { %v229_v26 = vadd.f32 %v225_v25, %v147_v24 }
 0x1c0   :  { %v302_v27 = vpop.f32.mrf.mxu1 }
 0x1c1   :  { %231 = vst.msk [vmem:[#allocation2] sm:$0xff] %vm19_vm2, %v229_v26 }
 0x1c8   :  { %v235_v28 = vld [vmem:[#allocation2] sm:$0xff] }
 0x1c9   :  { %236 = vst.msk [vmem:[#allocation3] sm:$0xff] %vm19_vm2, %v235_v28 }
 0x1ca   :  { %321 = shalt.err (!%p318_p4)
}
 0x1cb   :  { %246 = dma.vmem_to_hbm [thread:$0]  %s244_s6, 128, %s415_s3, [#allocation4]  }
 0x1cc   :  { %330 = dma.done.wait [#allocation4], 128  }
 0x1cd   :  { %331 = vsyncadd [#allocation4], 4294967168 }
 0x1ce   :  { %250 = vsyncpa [#allocation4], 1 }

</bundles_post_ra>
